<compile_context>
chip_gen: v6e
topology: v6e:2x2x1
jax: 0.10.0
libtpu: 0.0.40
codegen_flags: <defaults>
</compile_context>

<pallas_src>
import jax
import jax.numpy as jnp
from jax.experimental import pallas as pl
from jax.experimental.pallas import tpu as pltpu


def _copy_kernel(x_ref, o_ref):
    # Pure pass-through of the tile currently resident in VMEM.
    o_ref[...] = x_ref[...]


# Widest lane-dense widths we try (all multiples of 128).
_LANE_CANDIDATES = (1024, 512, 256, 128)
# ~2 MiB per tile -> <= 8 MiB live (in + out, double buffered).
_TARGET_TILE_BYTES = 2 * 1024 * 1024


def _copy_2d(x2d: jax.Array, *, alias: bool) -> jax.Array:
    """Tiled, pipelined identity copy of a (rows, lanes) slab."""
    rows, lanes = x2d.shape
    itemsize = jnp.dtype(x2d.dtype).itemsize

    # Row tile: multiple of 8 (sublane), sized for ~2 MiB tiles, capped at 512.
    tile_r = max(8, min(512, _TARGET_TILE_BYTES // max(1, lanes * itemsize)))
    tile_r = (tile_r // 8) * 8
    if rows <= tile_r:
        tile_r = rows  # full-extent block is always legal

    grid = (pl.cdiv(rows, tile_r),)

    kwargs = {}
    if alias:
        # In-place pass-through: no second HBM buffer for the output.
        kwargs["input_output_aliases"] = {0: 0}

    return pl.pallas_call(
        _copy_kernel,
        out_shape=jax.ShapeDtypeStruct((rows, lanes), x2d.dtype),
        grid_spec=pl.GridSpec(
            grid=grid,
            in_specs=[pl.BlockSpec((tile_r, lanes), lambda i: (i, 0))],
            out_specs=pl.BlockSpec((tile_r, lanes), lambda i: (i, 0)),
        ),
        compiler_params=pltpu.CompilerParams(
            dimension_semantics=("parallel",),
        ),
        cost_estimate=pl.CostEstimate(
            flops=0,
            transcendentals=0,
            bytes_accessed=2 * rows * lanes * itemsize,
        ),
        **kwargs,
    )(x2d)


def mlp_identity(x: jax.Array, z: jax.Array) -> jax.Array:
    """Pallas implementation of MLPIdentity.forward(x, z) == x.

    `z` is accepted (mirroring the PyTorch signature) but unused, exactly as
    in the reference module.
    """
    del z  # unused by the reference forward pass

    total = x.size
    if total == 0:
        return x  # nothing to copy

    flat = x.reshape(-1)

    # Lane-dense re-view: widest multiple of 128 dividing the element count.
    lanes = next((l for l in _LANE_CANDIDATES if total % l == 0), None)

    if lanes is not None:
        out2d = _copy_2d(flat.reshape(total // lanes, lanes), alias=True)
        return out2d.reshape(x.shape)

    # Ragged fallback: pad to a multiple of 128 lanes, copy, drop the tail.
    # (No aliasing: padded shape differs from the output we hand back.)
    lanes = 128
    padded = pl.cdiv(total, lanes) * lanes
    flat_p = jnp.pad(flat, (0, padded - total))
    out2d = _copy_2d(flat_p.reshape(padded // lanes, lanes), alias=False)
    return out2d.reshape(-1)[:total].reshape(x.shape)


if __name__ == "__main__":
    key = jax.random.PRNGKey(0)
    kx, kz, kx2, kx3 = jax.random.split(key, 4)

    fwd = jax.jit(mlp_identity)

    # Primary case mirroring the module: x (..., input_dim), z (..., skip_dim).
    batch, seq, input_dim, skip_dim = 2, 8, 32, 16
    x = jax.random.normal(kx, (batch, seq, input_dim), dtype=jnp.float32)
    z = jax.random.normal(kz, (batch, seq, skip_dim), dtype=jnp.float32)
    y = fwd(x, z)
    jax.block_until_ready(y)
    assert y.shape == x.shape and y.dtype == x.dtype
    assert bool(jnp.array_equal(y, x))

    # Multi-tile path (rows > tile -> pipelined grid of >1 step).
    x2 = jax.random.normal(kx2, (32, 256, 128), dtype=jnp.float32)
    y2 = fwd(x2, z)
    jax.block_until_ready(y2)
    assert bool(jnp.array_equal(y2, x2))

    # Ragged path (element count not a multiple of 128).
    x3 = jax.random.normal(kx3, (3, 5, 7), dtype=jnp.float32)
    y3 = fwd(x3, z)
    jax.block_until_ready(y3)
    assert bool(jnp.array_equal(y3, x3))

    print("KERNEL_OK")
</pallas_src>

<mosaic_0001>
module attributes {stable_mosaic.version = 11 : i64} {
  func.func @_copy_kernel(%arg0: i32, %arg1: memref<1x512xf32, #tpu.memory_space<vmem>>, %arg2: memref<1x512xf32, #tpu.memory_space<vmem>>) attributes {dimension_semantics = [#tpu.dimension_semantics<parallel>], iteration_bounds = array<i64: 1>, scalar_prefetch = 0 : i64, scratch_operands = 0 : i64, tpu.core_type = #tpu.core_type<tc>, window_params = [{transform_indices = @transform_0, window_bounds = array<i64: 1, 512>}, {transform_indices = @transform_1, window_bounds = array<i64: 1, 512>}]} {
    %c0 = arith.constant 0 : index
    %c0_0 = arith.constant 0 : index
    %0 = vector.load %arg1[%c0, %c0_0] : memref<1x512xf32, #tpu.memory_space<vmem>>, vector<1x512xf32>
    %c0_1 = arith.constant 0 : index
    %c0_2 = arith.constant 0 : index
    %1 = vector.load %arg2[%c0_1, %c0_2] : memref<1x512xf32, #tpu.memory_space<vmem>>, vector<1x512xf32>
    tpu.vector_store %arg2[%c0_1, %c0_2], %0 {strides = array<i32>} : memref<1x512xf32, #tpu.memory_space<vmem>>, vector<1x512xf32>,
    return
  }
  func.func @transform_0(%arg0: i32) -> (i32, i32) {
    %c0_i32 = arith.constant 0 : i32
    %c0_i32_0 = arith.constant 0 : i32
    return %arg0, %c0_i32 : i32, i32
  }
  func.func @transform_1(%arg0: i32) -> (i32, i32) {
    %c0_i32 = arith.constant 0 : i32
    %c0_i32_0 = arith.constant 0 : i32
    return %arg0, %c0_i32 : i32, i32
  }
}

</mosaic_0001>

<bundles_post_ra>
// kernel: mlp_identity.1
= control target key start
LH: loop header
LB: loop body
LE: loop exit
PB: predicated region body
PF: predicated region fallthrough
CT: control target
= control target key end

     0   :  { %v9_v0 = vlaneseq  ;;  %s34_s0 = inlined_call_operand.vmem [shape: f32[1,512], index: 0, kind: input, shape index: {}, may-alias: {0,1}]   ;;  %s35_s1 = inlined_call_operand.vmem [shape: f32[1,512], index: 1, kind: output, shape index: {}, may-alias: {0,1}]  }
   0x1   :  { %v8_v1 = vld [vmem:[%s34_s0] sm:$0xf] }
   0x2   :  { %vm11_vm0 = vcmp.lt.s32.totalorder %v9_v0, 512 }
   0x3   :  { %13 = vst.msk [vmem:[%s35_s1] sm:$0xf] %vm11_vm0, %v8_v1 }

</bundles_post_ra>
